<compile_context>
chip_gen: v7x
topology: tpu7x:2x2x1
jax: 0.10.0
libtpu: 0.0.40
codegen_flags: <defaults>
</compile_context>

<pallas_src>
import functools

import jax
import jax.numpy as jnp
from jax.experimental import pallas as pl
from jax.experimental.pallas import tpu as pltpu


# ----------------------------------------------------------------------------
# pltpu.roll convention probe (tiny kernel, run once): returns the sign s such
# that roll(x, shift=(s*d) % L) delivers element p+d at position p.
# ----------------------------------------------------------------------------
@functools.lru_cache(maxsize=1)
def _roll_sign():
    def probe(x_ref, o_ref):
        o_ref[...] = pltpu.roll(x_ref[...], shift=1, axis=1)

    x = jnp.broadcast_to(jnp.arange(128, dtype=jnp.int32), (8, 128))
    out = pl.pallas_call(
        probe, out_shape=jax.ShapeDtypeStruct((8, 128), jnp.int32))(x)
    return -1 if int(out[0, 0]) == 127 else 1


# ----------------------------------------------------------------------------
# In-kernel helper: scatter the 9 shifted+masked taps of a channel-major image
# into a bf16 im2col VMEM scratch (rows base + t*stride + c).
# ----------------------------------------------------------------------------
def _fill_im2col(dst_ref, x, masks_ref, *, width, cin, stride, base, roll_sign):
    # dst_ref   : (9*stride, L) bf16 VMEM scratch
    # x         : (cin, L) f32 value, channel-major flattened image (L = H*W)
    # masks_ref : (9, 1, L) f32 ref, per-tap validity mask (1-px zero-pad halo)
    L = x.shape[-1]
    for t in range(9):
        oy, ox = t // 3 - 1, t % 3 - 1
        shift = (roll_sign * (oy * width + ox)) % L
        shifted = x if shift == 0 else pltpu.roll(x, shift=shift, axis=1)
        tap = shifted if t == 4 else shifted * masks_ref[t]   # center tap: no mask
        r0 = base + t * stride
        dst_ref[r0:r0 + cin, :] = tap.astype(dst_ref.dtype)


# ----------------------------------------------------------------------------
# Fused surrogate-U-Net block kernel (one grid step = one batch element)
# ----------------------------------------------------------------------------
def _fused_block_kernel(x_ref, res_ref, mf_ref, mh_ref, s_ref, u_ref,
                        w1_ref, b1_ref, w2_ref, b2_ref, w3_ref, b3_ref,
                        w4_ref, b4_ref,
                        o_ref,
                        ic_half, ic_cat,
                        *, img_w, c_enc, c_mid, roll_sign):
    f32, bf16 = jnp.float32, jnp.bfloat16
    hw = x_ref.shape[-1]
    w_half = img_w // 2

    def conv_pertap(x, wt_ref, b_ref):
        # Per-tap accumulation: 9 small K=Cin MXU dots accumulated in f32
        # registers -- no im2col scratch round trip (vst slot is the scarce
        # resource here, the MXU has plenty of slack at M = Cout <= 32).
        acc = None
        for t in range(9):
            oy, ox = t // 3 - 1, t % 3 - 1
            shift = (roll_sign * (oy * img_w + ox)) % hw
            shifted = x if shift == 0 else pltpu.roll(x, shift=shift, axis=1)
            tap = shifted if t == 4 else shifted * mf_ref[t]
            d = jnp.dot(wt_ref[t], tap.astype(bf16), preferred_element_type=f32)
            acc = d if acc is None else acc + d
        return acc + b_ref[...]

    def conv_merged(w_ref, b_ref, ic_ref):
        # (Cout, 9*Cin) bf16 @ (9*Cin, L) bf16 -> f32; lane-dense output (L).
        return (jnp.dot(w_ref[...], ic_ref[...], preferred_element_type=f32)
                + b_ref[...])

    x = x_ref[0]                                               # (c_enc, HW) f32

    # ---- conv1 (+ReLU): per-tap accumulation -----------------------------
    f1 = jnp.maximum(conv_pertap(x, w1_ref, b1_ref), 0.0)      # (c_enc, HW)

    # ---- 2x2 max pool: pairwise maxima via lane rolls, then a bf16 0/1
    # selection matmul compacts the even (y, x) positions -------------------
    m1 = jnp.maximum(f1, pltpu.roll(f1, shift=(roll_sign * 1) % hw, axis=1))
    m2 = jnp.maximum(m1, pltpu.roll(m1, shift=(roll_sign * img_w) % hw, axis=1))
    pooled = jnp.dot(m2.astype(bf16), s_ref[...],
                     preferred_element_type=f32)               # (c_enc, HW/4)

    # ---- conv2 (+ReLU) at half resolution: merged K = 9*c_enc matmul ------
    _fill_im2col(ic_half, pooled, mh_ref, width=w_half, cin=c_enc,
                 stride=c_enc, base=0, roll_sign=roll_sign)
    f2 = jnp.maximum(conv_merged(w2_ref, b2_ref, ic_half), 0.0)  # (c_mid, HW/4)

    # ---- nearest 2x upsample via a bf16 0/1 selection matmul (VMEM only) --
    up = jnp.dot(f2.astype(bf16), u_ref[...],
                 preferred_element_type=f32)                   # (c_mid, HW)

    # ---- conv3 (+ReLU) over the [up ; f1] skip concat as ONE matmul with
    # K = 9*(c_mid+c_enc); the concat exists only as im2col row offsets -----
    c_cat = c_mid + c_enc
    _fill_im2col(ic_cat, up, mf_ref, width=img_w, cin=c_mid, stride=c_cat,
                 base=0, roll_sign=roll_sign)
    _fill_im2col(ic_cat, f1, mf_ref, width=img_w, cin=c_enc, stride=c_cat,
                 base=c_mid, roll_sign=roll_sign)
    f3 = jnp.maximum(conv_merged(w3_ref, b3_ref, ic_cat), 0.0)   # (c_enc, HW)

    # ---- conv4 (per-tap) + fused residual add of the centre frame ---------
    out = conv_pertap(f3, w4_ref, b4_ref) + res_ref[0]          # (c_out, HW)
    o_ref[0] = out.astype(o_ref.dtype)


# ----------------------------------------------------------------------------
# Host-side constant builders (tap masks, pool / upsample selection matrices)
# ----------------------------------------------------------------------------
def _tap_masks(h, w):
    yy = jnp.arange(h * w, dtype=jnp.int32) // w
    xx = jnp.arange(h * w, dtype=jnp.int32) % w
    rows = []
    for t in range(9):
        oy, ox = t // 3 - 1, t % 3 - 1
        valid = ((yy + oy >= 0) & (yy + oy < h) &
                 (xx + ox >= 0) & (xx + ox < w))
        rows.append(valid.astype(jnp.float32))
    return jnp.stack(rows, axis=0).reshape(9, 1, h * w)


def _pool_select(h, w):
    hw, w2 = h * w, w // 2
    q = jnp.arange((h // 2) * w2, dtype=jnp.int32)
    src = (q // w2) * 2 * w + (q % w2) * 2
    return (jnp.arange(hw, dtype=jnp.int32)[:, None]
            == src[None, :]).astype(jnp.bfloat16)             # (HW, HW/4) bf16


def _upsample_select(h, w):
    hw, w2 = h * w, w // 2
    p = jnp.arange(hw, dtype=jnp.int32)
    src = (p // (2 * w)) * w2 + (p % w) // 2
    return (jnp.arange((h // 2) * w2, dtype=jnp.int32)[:, None]
            == src[None, :]).astype(jnp.bfloat16)             # (HW/4, HW) bf16


def _init_conv(key, cin, cout):
    fan_in = 9 * cin
    w = jax.random.normal(key, (3, 3, cin, cout), jnp.float32) / jnp.sqrt(fan_in)
    b = jnp.zeros((cout,), jnp.float32)
    return w, b


def _conv_mat(w):
    # (3, 3, Cin, Cout) -> (Cout, 9*Cin); column index = (dy*3+dx)*Cin + c.
    cout = w.shape[-1]
    return jnp.transpose(w, (3, 0, 1, 2)).reshape(cout, -1)


def _conv_taps(w):
    # (3, 3, Cin, Cout) -> (9, Cout, Cin); tap index t = dy*3 + dx.
    cin, cout = w.shape[2], w.shape[3]
    return jnp.transpose(w, (0, 1, 3, 2)).reshape(9, cout, cin)


# ----------------------------------------------------------------------------
# Single_Stage module (parameters + forward)
# ----------------------------------------------------------------------------
class SingleStagePallas:
    C_ENC = 16   # encoder width of the surrogate block
    C_MID = 32   # bottleneck width

    def __init__(self, in_frames=3, color=True, sigma_map=True, *, key):
        self.in_frames = in_frames
        self.sigma_map = sigma_map
        channel = 3 if color else 1
        self.channel = channel
        # NOTE: mirrors the reference __init__ (hard-codes 3 frames in `in1`),
        # so in_frames=3 is the consistent configuration.
        in1 = (3 + (1 if sigma_map else 0)) * channel
        assert in1 <= self.C_ENC
        self.in1 = in1

        k1, k2, k3, k4 = jax.random.split(key, 4)
        w1, b1 = _init_conv(k1, in1, self.C_ENC)
        w2, b2 = _init_conv(k2, self.C_ENC, self.C_MID)
        w3, b3 = _init_conv(k3, self.C_MID + self.C_ENC, self.C_ENC)
        w4, b4 = _init_conv(k4, self.C_ENC, channel)
        # f32 originals kept only for the pure-JAX reference path.
        self._w1, self._w2, self._w3, self._w4 = w1, w2, w3, w4
        self._b1v, self._b2v, self._b3v, self._b4v = b1, b2, b3, b4

        # conv1 input channels zero-padded to C_ENC so every row block is
        # sublane aligned.  conv1/conv4: per-tap (9, Cout, Cin) bf16 weights;
        # conv2/conv3: merged (Cout, 9*Cin) bf16 matrices.
        w1p = jnp.concatenate(
            [w1, jnp.zeros((3, 3, self.C_ENC - in1, self.C_ENC), jnp.float32)],
            axis=2)
        self.w1t = _conv_taps(w1p).astype(jnp.bfloat16)
        self.w2m = _conv_mat(w2).astype(jnp.bfloat16)
        self.w3m = _conv_mat(w3).astype(jnp.bfloat16)
        self.w4t = _conv_taps(w4).astype(jnp.bfloat16)
        self.b1 = b1.reshape(-1, 1)
        self.b2 = b2.reshape(-1, 1)
        self.b3 = b3.reshape(-1, 1)
        self.b4 = b4.reshape(-1, 1)

        self._roll_sign = _roll_sign()
        self._geom_cache = {}

    # ---- geometry constants (per image size), cached ----------------------
    def _geom(self, h, w):
        key = (h, w)
        if key not in self._geom_cache:
            self._geom_cache[key] = (
                _tap_masks(h, w), _tap_masks(h // 2, w // 2),
                _pool_select(h, w), _upsample_select(h, w))
        return self._geom_cache[key]

    # ---- fused block: one pallas_call over the batch ----------------------
    def _block(self, x_flat, res_flat, h, w):
        B = x_flat.shape[0]
        hw, hw4 = h * w, (h // 2) * (w // 2)
        ce, cm, co = self.C_ENC, self.C_MID, self.channel
        mf, mh, s_mat, u_mat = self._geom(h, w)

        kernel = functools.partial(
            _fused_block_kernel, img_w=w, c_enc=ce, c_mid=cm,
            roll_sign=self._roll_sign)

        # Advisory cost hint so XLA schedules the surrounding reshapes/concat
        # sensibly around the fused call.
        conv_macs = (ce * 9 * ce * hw + cm * 9 * ce * hw4
                     + ce * 9 * (cm + ce) * hw + co * 9 * ce * hw)
        sel_macs = ce * hw * hw4 + cm * hw4 * hw
        const_bytes = ((mf.size + mh.size) * 4
                       + (s_mat.size + u_mat.size) * 2
                       + (self.w1t.size + self.w2m.size
                          + self.w3m.size + self.w4t.size) * 2
                       + (ce + cm + ce + co) * 4)
        cost = pl.CostEstimate(
            flops=int(2 * B * (conv_macs + sel_macs)),
            transcendentals=0,
            bytes_accessed=int(B * (ce + 2 * co) * hw * 4 + const_bytes))

        grid_spec = pltpu.PrefetchScalarGridSpec(
            num_scalar_prefetch=0,
            grid=(B,),
            in_specs=[
                pl.BlockSpec((1, ce, hw), lambda b: (b, 0, 0)),        # x
                pl.BlockSpec((1, co, hw), lambda b: (b, 0, 0)),        # residual
                pl.BlockSpec((9, 1, hw), lambda b: (0, 0, 0)),         # masks full
                pl.BlockSpec((9, 1, hw4), lambda b: (0, 0, 0)),        # masks half
                pl.BlockSpec((hw, hw4), lambda b: (0, 0)),             # pool sel bf16
                pl.BlockSpec((hw4, hw), lambda b: (0, 0)),             # upsample bf16
                pl.BlockSpec((9, ce, ce), lambda b: (0, 0, 0)),        # w1 per-tap
                pl.BlockSpec((ce, 1), lambda b: (0, 0)),               # b1
                pl.BlockSpec((cm, 9 * ce), lambda b: (0, 0)),          # w2 merged
                pl.BlockSpec((cm, 1), lambda b: (0, 0)),               # b2
                pl.BlockSpec((ce, 9 * (cm + ce)), lambda b: (0, 0)),   # w3 merged
                pl.BlockSpec((ce, 1), lambda b: (0, 0)),               # b3
                pl.BlockSpec((9, co, ce), lambda b: (0, 0, 0)),        # w4 per-tap
                pl.BlockSpec((co, 1), lambda b: (0, 0)),               # b4
            ],
            out_specs=pl.BlockSpec((1, co, hw), lambda b: (b, 0, 0)),
            scratch_shapes=[
                pltpu.VMEM((9 * ce, hw4), jnp.bfloat16),               # im2col half
                pltpu.VMEM((9 * (cm + ce), hw), jnp.bfloat16),         # im2col cat
            ],
        )
        return pl.pallas_call(
            kernel,
            out_shape=jax.ShapeDtypeStruct((B, co, hw), jnp.float32),
            grid_spec=grid_spec,
            compiler_params=pltpu.CompilerParams(
                dimension_semantics=("parallel",),
                vmem_limit_bytes=32 * 1024 * 1024),
            cost_estimate=cost,
        )(x_flat, res_flat, mf, mh, s_mat, u_mat,
          self.w1t, self.b1, self.w2m, self.b2, self.w3m, self.b3,
          self.w4t, self.b4)

    # ---- forward -----------------------------------------------------------
    def __call__(self, data):
        # data: (B, in_frames [+1 sigma-map frame], C, H, W).
        frames = data[:, :self.in_frames]
        b, n, c, h, w = frames.shape
        assert h % 2 == 0 and w % 2 == 0, "H and W must be even (2x2 max pool)"
        assert (h * w) % 128 == 0 and ((h // 2) * (w // 2)) % 128 == 0, \
            "H*W (and H*W/4) must be lane-dense multiples of 128"

        if self.sigma_map:
            sig = data[:, self.in_frames]                     # (B, C, H, W)
            x = jnp.concatenate([frames.reshape(b, n * c, h, w), sig], axis=1)
            assert n * c + c == self.in1, "in_frames inconsistent with block"
        else:
            x = frames.reshape(b, n * c, h, w)
            assert n * c == self.in1, "in_frames inconsistent with block"
        ref = frames[:, n // 2 + n % 2]                       # reference index

        # Channel-major + flattened spatial (lane axis); pad channels to C_ENC.
        x_flat = x.reshape(b, self.in1, h * w).astype(jnp.float32)
        pad = self.C_ENC - self.in1
        if pad:
            x_flat = jnp.concatenate(
                [x_flat, jnp.zeros((b, pad, h * w), jnp.float32)], axis=1)
        res_flat = ref.reshape(b, c, h * w).astype(jnp.float32)

        out_flat = self._block(x_flat, res_flat, h, w)
        return out_flat.reshape(b, c, h, w)

    # ---- pure-JAX reference of the same surrogate block (for testing) -----
    def reference_forward(self, data):
        frames = data[:, :self.in_frames]
        b, n, c, h, w = frames.shape
        if self.sigma_map:
            sig = data[:, self.in_frames]
            x = jnp.concatenate([frames.reshape(b, n * c, h, w), sig], axis=1)
        else:
            x = frames.reshape(b, n * c, h, w)
        ref = frames[:, n // 2 + n % 2]

        def conv(t, wgt, bias):
            y = jax.lax.conv_general_dilated(
                t, wgt, (1, 1), "SAME",
                dimension_numbers=("NCHW", "HWIO", "NCHW"))
            return y + bias.reshape(1, -1, 1, 1)

        f1 = jax.nn.relu(conv(x, self._w1, self._b1v))
        p = f1.reshape(b, self.C_ENC, h // 2, 2, w // 2, 2).max(axis=(3, 5))
        f2 = jax.nn.relu(conv(p, self._w2, self._b2v))
        up = jnp.repeat(jnp.repeat(f2, 2, axis=2), 2, axis=3)
        cat = jnp.concatenate([up, f1], axis=1)
        f3 = jax.nn.relu(conv(cat, self._w3, self._b3v))
        return conv(f3, self._w4, self._b4v) + ref


# ----------------------------------------------------------------------------
# Demo
# ----------------------------------------------------------------------------
if __name__ == "__main__":
    key = jax.random.PRNGKey(0)
    k_param, k_data = jax.random.split(key)

    B, IN_FRAMES, C, H, W = 2, 3, 3, 32, 32
    model = SingleStagePallas(in_frames=IN_FRAMES, color=True, sigma_map=True,
                              key=k_param)

    # (B, in_frames + 1 sigma-map frame, C, H, W), NCHW per frame
    data = jax.random.normal(k_data, (B, IN_FRAMES + 1, C, H, W), jnp.float32)

    out = model(data)
    out = jax.block_until_ready(out)
    assert out.shape == (B, C, H, W), out.shape
    assert bool(jnp.all(jnp.isfinite(out)))

    # Correctness check against the pure-JAX reference of the same surrogate
    # block (bf16 MXU path => loose tolerance).
    ref_out = model.reference_forward(data)
    max_err = float(jnp.max(jnp.abs(out - ref_out)))
    assert bool(jnp.allclose(out, ref_out, rtol=5e-2, atol=1e-1)), max_err

    print("KERNEL_OK")
</pallas_src>

<mosaic_0001>
module attributes {stable_mosaic.version = 11 : i64} {
  func.func @probe(%arg0: memref<8x128xi32, #tpu.memory_space<vmem>>, %arg1: memref<8x128xi32, #tpu.memory_space<vmem>>) attributes {dimension_semantics = [], scalar_prefetch = 0 : i64, scratch_operands = 0 : i64, tpu.core_type = #tpu.core_type<tc>} {
    %c0 = arith.constant 0 : index
    %c0_0 = arith.constant 0 : index
    %0 = vector.load %arg0[%c0, %c0_0] : memref<8x128xi32, #tpu.memory_space<vmem>>, vector<8x128xi32>
    %c1_i32 = arith.constant 1 : i32
    %1 = tpu.dynamic_rotate %0 by %c1_i32 dim 1 : vector<8x128xi32>, i32 -> vector<8x128xi32>
    %c0_1 = arith.constant 0 : index
    %c0_2 = arith.constant 0 : index
    %2 = vector.load %arg1[%c0_1, %c0_2] : memref<8x128xi32, #tpu.memory_space<vmem>>, vector<8x128xi32>
    tpu.vector_store %arg1[%c0_1, %c0_2], %1 {strides = array<i32>} : memref<8x128xi32, #tpu.memory_space<vmem>>, vector<8x128xi32>,
    return
  }
}

</mosaic_0001>

<bundles_post_ra>
// kernel: tpu_custom_call.1
= control target key start
LH: loop header
LB: loop body
LE: loop exit
PB: predicated region body
PF: predicated region fallthrough
CT: control target
= control target key end

     0   :  { %6 = vsyncpa [#allocation3], 0  ;;  %s128_s0 = inlined_call_operand.hbm [shape: s32[8,128], index: 0, kind: input, shape index: {}]   ;;  %s129_s1 = inlined_call_operand.hbm [shape: s32[8,128], index: 1, kind: output, shape index: {}]  }
   0x1   :  { %7 = vsyncpa [#allocation4], 0  ;;  %s91_s6 = smov [#allocation2]   ;;  %s43_s10 = scalar_lea.hbm %s128_s0, 128 }
   0x2   :  { %s14_s7 = sshll.u32 %s91_s6, 4  ;;  %p44_p0 = scmp.ne.s32.totalorder %s128_s0, %s43_s10  ;;  %s15_s7 = int_to_ptr.vmem [resolvable:$true] %s14_s7 }
   0x3   :  { %p47_p1 = scmp.lt.u32.totalorder %s43_s10, %s128_s0 }
   0x5   :  { %p49_p2 = pnand %p47_p1, %p44_p0 }
   0x7   :  { %52 = shalt.err (!%p49_p2)
}
   0x8   :  { %s53_s15 = scalar_lea.vmem %s15_s7, 128  ;;  %p58_p4 = scmp.lt.s32.totalorder %s15_s7, %s15_s7 }
   0x9   :  { %p54_p3 = scmp.ne.s32.totalorder %s15_s7, %s53_s15  ;;  %p59_p5 = scmp.lt.s32.totalorder %s53_s15, %s53_s15 }
   0xb   :  { %p60_p6 = por %p59_p5, %p58_p4 }
   0xd   :  { %p61_p7 = pnand %p60_p6, %p54_p3 }
   0xf   :  { %64 = shalt.err (!%p61_p7)
}
  0x10   :  { %17 = dma.hbm_to_vmem [thread:$0]  %s128_s0, 128, %s15_s7, [#allocation3]  }
  0x11   :  { %87 = dma.done.wait [#allocation3], 128  }
  0x12   :  { %88 = vsyncadd [#allocation3], 4294967168  ;;  %v21_v0 = vld [vmem:[#allocation2] sm:$0xff]  ;;  %s92_s18 = smov 1   ;;  %s93_s19 = smov [#allocation5]  }
  0x13   :  { %22 = vrot.lane.b32.xlu0 %v21_v0, %s92_s18  ;;  %s31_s20 = sshll.u32 %s93_s19, 4  ;;  %s32_s20 = int_to_ptr.vmem [resolvable:$true] %s31_s20 }
  0x14   :  { %s65_s21 = scalar_lea.vmem %s32_s20, 128  ;;  %p70_p9 = scmp.lt.s32.totalorder %s32_s20, %s32_s20 }
  0x15   :  { %p66_p8 = scmp.ne.s32.totalorder %s32_s20, %s65_s21  ;;  %p71_p10 = scmp.lt.s32.totalorder %s65_s21, %s65_s21 }
  0x17   :  { %p72_p11 = por %p71_p10, %p70_p9 }
  0x19   :  { %p73_p12 = pnand %p72_p11, %p66_p8 }
  0x85   :  { %v23_v1 = vpop.permute.xlu0 %22 }
  0x86   :  { %24 = vst [vmem:[#allocation5] sm:$0xff] %v23_v1 }
  0x87   :  { %76 = shalt.err (!%p73_p12)
}
  0x88   :  { %s77_s0 = scalar_lea.hbm %s129_s1, 128 }
  0x89   :  { %p78_p13 = scmp.ne.s32.totalorder %s129_s1, %s77_s0  ;;  %p81_p0 = scmp.lt.u32.totalorder %s77_s0, %s129_s1 }
  0x8b   :  { %p83_p1 = pnand %p81_p0, %p78_p13 }
  0x8d   :  { %86 = shalt.err (!%p83_p1)
}
  0x8e   :  { %34 = dma.vmem_to_hbm [thread:$0]  %s32_s20, 128, %s129_s1, [#allocation4]  }
  0x8f   :  { %89 = dma.done.wait [#allocation4], 128  }
  0x90   :  { %90 = vsyncadd [#allocation4], 4294967168 }
  0x91   :  { %38 = vsyncpa [#allocation3], 1 }
  0x92   :  { %39 = vsyncpa [#allocation4], 1 }

</bundles_post_ra>
